<compile_context>
chip_gen: v5e
topology: v5e:2x2
jax: 0.10.0
libtpu: 0.0.40
codegen_flags: <defaults>
</compile_context>

<pallas_src>
import math
import functools

import jax
import jax.numpy as jnp
from jax.experimental import pallas as pl
from jax.experimental.pallas import tpu as pltpu


_LANES = 128
_SUBLANES = 8
# Per-block budget for the x tile. Conservative enough that double-buffered
# x-in / out (+ random-bits stream in training) stays well inside the scoped
# VMEM limit on every generation, including v7x's 64 MiB VMEM.
_X_BLOCK_BUDGET_BYTES = 4 * 1024 * 1024
_VMEM_LIMIT_BYTES = 40 * 1024 * 1024


def make_positional_table(d_model: int, max_len: int = 512) -> jnp.ndarray:
    """Replicates the torch __init__ pe construction. Shape (max_len, d_model)."""
    position = jnp.arange(0, max_len, dtype=jnp.float32)[:, None]            # (L, 1)
    div_term = jnp.exp(
        jnp.arange(0, d_model, 2, dtype=jnp.float32) * (-math.log(10000.0) / d_model)
    )                                                                         # (D/2,)
    args = position * div_term                                                # (L, D/2)
    pe = jnp.zeros((max_len, d_model), dtype=jnp.float32)
    pe = pe.at[:, 0::2].set(jnp.sin(args))
    pe = pe.at[:, 1::2].set(jnp.cos(args))
    return pe


# ---------------------------------------------------------------------------
# Tile selection
# ---------------------------------------------------------------------------

def _divisors(n: int):
    out = set()
    i = 1
    while i * i <= n:
        if n % i == 0:
            out.add(i)
            out.add(n // i)
        i += 1
    return sorted(out)


def _pick_tiles(batch: int, lanes: int, itemsize: int):
    """Pick (tb, tl): layout-legal blocks that divide (batch, lanes) exactly and
    keep the x block under the per-block VMEM budget (pipeline-friendly)."""
    max_elems = max(_X_BLOCK_BUDGET_BYTES // itemsize, _LANES)

    # Sublane (batch) tile: full extent when small / not 8-divisible (full
    # extent is always layout-legal); otherwise a multiple of 8 dividing B.
    if batch % _SUBLANES != 0 or batch <= _SUBLANES:
        tb = batch
    else:
        cap = max(_SUBLANES, min(batch, max_elems // _LANES))
        tb = max(d for d in _divisors(batch) if d % _SUBLANES == 0 and d <= cap)

    # Lane tile: biggest multiple of 128 dividing S*D that fits the budget with
    # tb rows; full extent when it already fits (or nothing divides cleanly).
    lane_cap = max(_LANES, max_elems // tb)
    if lanes <= lane_cap:
        tl = lanes
    else:
        cands = [d for d in _divisors(lanes) if d % _LANES == 0 and d <= lane_cap]
        tl = max(cands) if cands else lanes
    return tb, tl


# ---------------------------------------------------------------------------
# Kernels
# ---------------------------------------------------------------------------

def _pe_add_kernel(x_ref, pe_ref, o_ref):
    # Lane-dense elementwise add; pe block is (1, tl) and broadcasts over the
    # sublane (batch) axis. Single broadcast per invocation (no in-kernel loop).
    o_ref[...] = x_ref[...] + pe_ref[...]


def _pe_add_dropout_kernel(x_ref, pe_ref, bits_ref, o_ref, *, threshold: int,
                           scale: float):
    # Inverted dropout matching nn.Dropout(p) training semantics (Bernoulli
    # keep-prob 1-p; mask distribution, not torch's RNG bit stream).
    # keep iff raw uint32 bits >= threshold  =>  P(keep) = 1 - p.
    y = x_ref[...] + pe_ref[...]
    keep = bits_ref[...] >= jnp.uint32(threshold)
    o_ref[...] = jnp.where(keep, y * scale, jnp.zeros_like(y))


# ---------------------------------------------------------------------------
# pallas_call wrapper (lane-dense 2-D view)
# ---------------------------------------------------------------------------

def _pallas_pe_2d(x2d, pe_row, bits=None, *, dropout_p: float = 0.0):
    B, L = x2d.shape
    tb, tl = _pick_tiles(B, L, x2d.dtype.itemsize)
    # Lane-chunk axis is OUTER, batch axis is INNER: pe's block index only
    # depends on the outer axis, so it stays resident in VMEM across the inner
    # batch steps (no redundant HBM re-reads of pe).
    grid = (L // tl, B // tb)

    x_spec = pl.BlockSpec((tb, tl), lambda li, bi: (bi, li))
    pe_spec = pl.BlockSpec((1, tl), lambda li, bi: (0, li))
    out_spec = pl.BlockSpec((tb, tl), lambda li, bi: (bi, li))
    out_shape = jax.ShapeDtypeStruct((B, L), x2d.dtype)

    cparams = pltpu.CompilerParams(
        dimension_semantics=("parallel", "parallel"),   # v7x: shard across 2 TCs
        vmem_limit_bytes=_VMEM_LIMIT_BYTES,
    )

    if bits is None:
        return pl.pallas_call(
            _pe_add_kernel,
            out_shape=out_shape,
            grid_spec=pltpu.PrefetchScalarGridSpec(
                num_scalar_prefetch=0, grid=grid,
                in_specs=[x_spec, pe_spec], out_specs=out_spec),
            compiler_params=cparams,
        )(x2d, pe_row)

    threshold = min(int(round(dropout_p * (1 << 32))), (1 << 32) - 1)
    scale = 1.0 / (1.0 - dropout_p)
    kernel = functools.partial(_pe_add_dropout_kernel,
                               threshold=threshold, scale=scale)
    bits_spec = pl.BlockSpec((tb, tl), lambda li, bi: (bi, li))
    return pl.pallas_call(
        kernel,
        out_shape=out_shape,
        grid_spec=pltpu.PrefetchScalarGridSpec(
            num_scalar_prefetch=0, grid=grid,
            in_specs=[x_spec, pe_spec, bits_spec], out_specs=out_spec),
        compiler_params=cparams,
    )(x2d, pe_row, bits)


def positional_encoding(x, pe_table, *, dropout_p: float = 0.1,
                        training: bool = False, rng_key=None):
    """Forward of PositionalEncoding: dropout(x + pe[:S]).

    x: (S, B, D); pe_table: (max_len, D). Returns (S, B, D), same dtype as x.
    """
    S, B, D = x.shape
    max_len, d_model = pe_table.shape
    if S > max_len:
        raise ValueError(f"seq_len {S} exceeds max_len {max_len}")
    if D != d_model:
        raise ValueError(f"d_model mismatch: x has {D}, pe_table has {d_model}")

    L = S * D
    # Lane-dense layout: (S, B, D) -> (B, S*D); pe -> (1, S*D). Wrapper-side
    # reshape/transpose is layout plumbing so the kernel sees wide, unmasked
    # lane-dense stores.
    x2d = jnp.transpose(x, (1, 0, 2)).reshape(B, L)
    pe_row = pe_table[:S].astype(x.dtype).reshape(1, L)

    use_dropout = training and dropout_p > 0.0
    if use_dropout and dropout_p >= 1.0:
        return jnp.zeros_like(x)

    if use_dropout:
        if rng_key is None:
            rng_key = jax.random.PRNGKey(0)
        # Bits are drawn once over the whole array: the dropout mask does not
        # depend on kernel tiling, and per-call uniqueness comes from rng_key.
        bits = jax.random.bits(rng_key, (B, L), dtype=jnp.uint32)
        out2d = _pallas_pe_2d(x2d, pe_row, bits, dropout_p=float(dropout_p))
    else:
        out2d = _pallas_pe_2d(x2d, pe_row)

    return jnp.transpose(out2d.reshape(B, S, D), (1, 0, 2))


if __name__ == "__main__":
    d_model = 32
    max_len = 512
    seq_len = 8
    batch = 2

    key = jax.random.PRNGKey(0)
    x = jax.random.normal(key, (seq_len, batch, d_model), dtype=jnp.float32)
    pe_table = make_positional_table(d_model, max_len)

    # Eval-mode forward (dropout is identity); deterministic and checkable.
    out = jax.block_until_ready(
        positional_encoding(x, pe_table, dropout_p=0.1, training=False))
    ref = x + pe_table[:seq_len][:, None, :]
    assert jnp.allclose(out, ref, atol=1e-6), "eval-path mismatch vs reference"

    # Training-mode dropout path: every output element is either exactly 0
    # (dropped) or (x + pe) / (1 - p) (kept, inverted-dropout scaling).
    p = 0.1
    out_tr = jax.block_until_ready(
        positional_encoding(x, pe_table, dropout_p=p, training=True,
                            rng_key=jax.random.PRNGKey(1234)))
    scaled = ref / (1.0 - p)
    consistent = jnp.all(
        (out_tr == 0.0)
        | (jnp.abs(out_tr - scaled) <= 1e-5 * (1.0 + jnp.abs(scaled))))
    assert bool(consistent), "training-path dropout output inconsistent"

    print("KERNEL_OK")
</pallas_src>

<mosaic_0001>
module attributes {stable_mosaic.version = 11 : i64} {
  func.func @_pe_add_kernel(%arg0: i32, %arg1: i32, %arg2: memref<2x256xf32, #tpu.memory_space<vmem>>, %arg3: memref<1x256xf32, #tpu.memory_space<vmem>>, %arg4: memref<2x256xf32, #tpu.memory_space<vmem>>) attributes {dimension_semantics = [#tpu.dimension_semantics<parallel>, #tpu.dimension_semantics<parallel>], iteration_bounds = array<i64: 1, 1>, scalar_prefetch = 0 : i64, scratch_operands = 0 : i64, tpu.core_type = #tpu.core_type<tc>, window_params = [{transform_indices = @transform_0, window_bounds = array<i64: 2, 256>}, {transform_indices = @transform_1, window_bounds = array<i64: 1, 256>}, {transform_indices = @transform_2, window_bounds = array<i64: 2, 256>}]} {
    %c0 = arith.constant 0 : index
    %c0_0 = arith.constant 0 : index
    %0 = vector.load %arg2[%c0, %c0_0] : memref<2x256xf32, #tpu.memory_space<vmem>>, vector<2x256xf32>
    %c0_1 = arith.constant 0 : index
    %c0_2 = arith.constant 0 : index
    %1 = vector.load %arg3[%c0_1, %c0_2] : memref<1x256xf32, #tpu.memory_space<vmem>>, vector<1x256xf32>
    %2 = vector.broadcast %1 : vector<1x256xf32> to vector<2x256xf32>
    %3 = arith.addf %0, %2 : vector<2x256xf32>
    %c0_3 = arith.constant 0 : index
    %c0_4 = arith.constant 0 : index
    %4 = vector.load %arg4[%c0_3, %c0_4] : memref<2x256xf32, #tpu.memory_space<vmem>>, vector<2x256xf32>
    tpu.vector_store %arg4[%c0_3, %c0_4], %3 {strides = array<i32>} : memref<2x256xf32, #tpu.memory_space<vmem>>, vector<2x256xf32>,
    return
  }
  func.func @transform_0(%arg0: i32, %arg1: i32) -> (i32, i32) {
    %c0_i32 = arith.constant 0 : i32
    return %arg1, %arg0 : i32, i32
  }
  func.func @transform_1(%arg0: i32, %arg1: i32) -> (i32, i32) {
    %c0_i32 = arith.constant 0 : i32
    %c0_i32_0 = arith.constant 0 : i32
    return %c0_i32, %arg0 : i32, i32
  }
  func.func @transform_2(%arg0: i32, %arg1: i32) -> (i32, i32) {
    %c0_i32 = arith.constant 0 : i32
    return %arg1, %arg0 : i32, i32
  }
}

</mosaic_0001>

<bundles_post_ra>
// kernel: tpu_custom_call.1
= control target key start
LH: loop header
LB: loop body
LE: loop exit
PB: predicated region body
PF: predicated region fallthrough
CT: control target
= control target key end

     0   :  { %7 = vsyncpa [#allocation3], 0  ;;  %s177_s0 = inlined_call_operand.hbm [shape: f32[2,256], index: 0, kind: input, shape index: {}]   ;;  %s178_s1 = inlined_call_operand.hbm [shape: f32[1,256], index: 1, kind: input, shape index: {}]   ;;  %s179_s2 = inlined_call_operand.hbm [shape: f32[2,256], index: 2, kind: output, shape index: {}]  }
   0x1   :  { %8 = vsyncpa [#allocation6], 0 }
   0x2   :  { %9 = vsyncpa [#allocation4], 0  ;;  %s15_s11 = sshll.u32 %s177_s0, 4  ;;  %s150_s12 = smov [#allocation2]   ;;  %s16_s11 = int_to_ptr.hbm [resolvable:$true] %s15_s11 }
   0x3   :  { %s17_s13 = sshll.u32 %s150_s12, 4  ;;  %s26_s16 = sshll.u32 %s178_s1, 4  ;;  %s18_s13 = int_to_ptr.vmem [resolvable:$true] %s17_s13  ;;  %s27_s16 = int_to_ptr.hbm [resolvable:$true] %s26_s16 }
   0x4   :  { %20 = dma.hbm_to_vmem [thread:$0]  %s16_s11, 64, %s18_s13, [#allocation3]  }
   0x5   :  { %s151_s17 = smov [#allocation5]  }
   0x6   :  { %s28_s18 = sshll.u32 %s151_s17, 4  ;;  %s29_s18 = int_to_ptr.vmem [resolvable:$true] %s28_s18 }
   0x7   :  { %31 = dma.hbm_to_vmem [thread:$0]  %s27_s16, 32, %s29_s18, [#allocation6]  }
   0x8   :  { %144 = dma.done.wait [#allocation3], 64  }
   0x9   :  { %145 = vsyncadd [#allocation3], 4294967232 }
   0xa   :  { %146 = dma.done.wait [#allocation6], 32  }
   0xb   :  { %147 = vsyncadd [#allocation6], 4294967264  ;;  %v41_v0 = vld [vmem:[#allocation5] sm:$0x3]  ;;  %vm46_vm0 = vcmask 1041408   ;;  %s152_s0 = smov [#allocation7]  }
   0xc   :  { %v43_v1 = vperm.slane %v41_v0, 0  ;;  %v44_v2 = vperm.slane %v41_v0, 1  ;;  %v40_v3 = vld [vmem:[#allocation2] sm:$0xf]  ;;  %s56_s19 = sshll.u32 %s152_s0, 4  ;;  %s58_s21 = sshll.u32 %s179_s2, 4  ;;  %s57_s19 = int_to_ptr.vmem [resolvable:$true] %s56_s19  ;;  %s59_s21 = int_to_ptr.hbm [resolvable:$true] %s58_s21 }
   0xe   :  { %v45_v4 = vrot.slane %v44_v2, 6 }
  0x10   :  { %v47_v5 = vsel %vm46_vm0, %v43_v1, %v45_v4 }
  0x11   :  { %v49_v6 = vadd.f32 %v47_v5, %v40_v3 }
  0x13   :  { %50 = vst [vmem:[#allocation7] sm:$0xf] %v49_v6 }
  0x14   :  { %61 = dma.vmem_to_hbm [thread:$0]  %s57_s19, 64, %s59_s21, [#allocation4]  }
  0x15   :  { %148 = dma.done.wait [#allocation4], 64  }
  0x16   :  { %149 = vsyncadd [#allocation4], 4294967232 }
  0x17   :  { %66 = vsyncpa [#allocation3], 1 }
  0x18   :  { %67 = vsyncpa [#allocation6], 1 }
  0x19   :  { %68 = vsyncpa [#allocation4], 1 }

</bundles_post_ra>
